<compile_context>
chip_gen: v7x
topology: tpu7x:2x2x1
jax: 0.10.0
libtpu: 0.0.40
codegen_flags: <defaults>
</compile_context>

<pallas_src>
import functools

import jax
import jax.numpy as jnp
from jax.experimental import pallas as pl
from jax.experimental.pallas import tpu as pltpu

ALPHA = 0.8
GAMMA = 2.0

_LANE = 128
_STRIP = 512                      # in-kernel compute strip: (512, 128) f32 = 256 KiB
_BLOCK_ROWS = 8192                # grid block: (8192, 128) f32 = 4 MiB per stream buffer
_VMEM_LIMIT = 32 * 1024 * 1024    # explicit scoped-VMEM budget (v5e default is 16 MiB)


def _bce_elementwise(x, t):
    """Per-element BCE in f32, mirroring torch: sigmoid -> clamped-log BCE."""
    # Stable sigmoid with a single exp; saturates to exactly 0.0 / 1.0 the same
    # way torch's f32 sigmoid does (so log(1-p) clamps to -100 for large +x).
    e = jnp.exp(-jnp.abs(x))
    inv = 1.0 / (1.0 + e)
    p = jnp.where(x >= 0.0, inv, e * inv)
    # torch.binary_cross_entropy clamps each log term at -100.
    log_p = jnp.maximum(jnp.log(p), -100.0)
    log_1mp = jnp.maximum(jnp.log(1.0 - p), -100.0)
    # -(t*log_p + (1-t)*log_1mp), fused to save a couple of VALU ops.
    return -(log_1mp + t * (log_p - log_1mp))


def _bce_partial_sum_kernel(x_ref, t_ref, out_ref, acc_ref, *,
                            rows, tiles_per_split, strip):
    """Accumulates the BCE sum of one split of row blocks into an (8,128) acc.

    x_ref   : VMEM (br, 128)  logits block (native dtype, upcast in-kernel)
    t_ref   : VMEM (br, 128)  targets block (native dtype, upcast in-kernel)
    out_ref : VMEM (8, 128)   per-split partial sums (reduced in the wrapper)
    acc_ref : VMEM (8, 128)   running f32 accumulator
    rows            : total valid rows of the (rows, 128) slab (static)
    tiles_per_split : inner grid extent (static)
    strip           : rows per compute strip; divides the block rows (static)
    """
    s = pl.program_id(0)
    i = pl.program_id(1)

    @pl.when(i == 0)
    def _init():
        acc_ref[...] = jnp.zeros_like(acc_ref)

    br = x_ref.shape[0]
    n_strips = br // strip
    # Unclamped logical block index: overrun tiles (from the 2-way split with
    # an odd block count) land past `rows` and mask to zero below.
    logical = s * tiles_per_split + i
    block_row0 = logical * br

    @pl.loop(0, n_strips)
    def _per_strip(k):
        r0 = pl.multiple_of(k * strip, strip)
        x = x_ref[pl.ds(r0, strip), :].astype(jnp.float32)
        t = t_ref[pl.ds(r0, strip), :].astype(jnp.float32)
        bce = _bce_elementwise(x, t)
        strip_row0 = block_row0 + r0

        @pl.when(strip_row0 + strip <= rows)
        def _full_strip():
            acc_ref[...] += bce.reshape(-1, 8, _LANE).sum(axis=0)

        @pl.when(strip_row0 + strip > rows)
        def _ragged_strip():
            # Partial trailing strip, or an overrun tile re-reading the last
            # block: zero out rows past `rows` (garbage-safe: where() drops
            # any NaN/Inf produced from uninitialized OOB rows).
            ridx = strip_row0 + jax.lax.broadcasted_iota(
                jnp.int32, (strip, _LANE), 0)
            masked = jnp.where(ridx < rows, bce, 0.0)
            acc_ref[...] += masked.reshape(-1, 8, _LANE).sum(axis=0)

    @pl.when(i == pl.num_programs(1) - 1)
    def _finalize():
        out_ref[...] = acc_ref[...]


@jax.jit
def focal_loss(inputs, targets):
    """Equivalent of FocalLoss.forward(inputs, targets) -> scalar f32."""
    assert inputs.size == targets.size
    n = inputs.size
    x = inputs.reshape(-1)
    t = targets.reshape(-1)
    # Keep the target stream narrow; never widen to f32 in the wrapper.
    # bool -> bf16 (2 B/elem; int8 would halve it again but bf16 has native
    # (16,128) tiling, the lowest-risk convert path). Other dtypes stay native.
    if t.dtype == jnp.bool_:
        t = t.astype(jnp.bfloat16)

    # The kernel consumes whole (8, 128)-aligned row groups; any leftover
    # (< 1024 elements) is reduced in plain JAX, so no whole-array pad/copy in
    # the common case (numel % 1024 == 0 -> pure metadata reshape).
    rows = (n // (8 * _LANE)) * 8
    main = rows * _LANE

    if main < n:
        xt = x[main:].astype(jnp.float32)
        tt = t[main:].astype(jnp.float32)
        tail_sum = jnp.sum(_bce_elementwise(xt, tt))
    else:
        tail_sum = jnp.float32(0.0)

    if rows == 0:
        bce_sum = tail_sum
    else:
        x2 = (x if main == n else x[:main]).reshape(rows, _LANE)
        t2 = (t if main == n else t[:main]).reshape(rows, _LANE)

        # Block rows: as big as possible (amortize per-step overhead), always a
        # multiple of the compute strip so the in-kernel loop is uniform.
        if rows <= _STRIP:
            br, strip = rows, rows
        else:
            br = min(_BLOCK_ROWS, (rows // _STRIP) * _STRIP)
            strip = _STRIP
        num_blocks = -(-rows // br)

        # Always split >= 2 blocks across the leading "parallel" axis so a
        # two-TensorCore chip (v7x) takes half each; odd block counts get one
        # overrun tile that is clamped in the index_map and masked in-kernel.
        n_splits = 2 if num_blocks >= 2 else 1
        tiles_per_split = -(-num_blocks // n_splits)

        def in_map(s_, i_):
            logical = s_ * tiles_per_split + i_
            return (jnp.minimum(logical, num_blocks - 1), 0)

        in_spec = pl.BlockSpec((br, _LANE), in_map)
        out_spec = pl.BlockSpec((8, _LANE), lambda s_, i_: (s_, 0))

        kernel = functools.partial(
            _bce_partial_sum_kernel,
            rows=rows, tiles_per_split=tiles_per_split, strip=strip)

        partials = pl.pallas_call(
            kernel,
            out_shape=jax.ShapeDtypeStruct((n_splits * 8, _LANE), jnp.float32),
            grid_spec=pltpu.PrefetchScalarGridSpec(
                num_scalar_prefetch=0,
                grid=(n_splits, tiles_per_split),
                in_specs=[in_spec, in_spec],
                out_specs=out_spec,
                scratch_shapes=[pltpu.VMEM((8, _LANE), jnp.float32)],
            ),
            compiler_params=pltpu.CompilerParams(
                dimension_semantics=("parallel", "arbitrary"),
                vmem_limit_bytes=_VMEM_LIMIT),
        )(x2, t2)

        bce_sum = jnp.sum(partials) + tail_sum

    bce_mean = bce_sum / jnp.float32(n)
    bce_exp = jnp.exp(-bce_mean)
    return ALPHA * (1.0 - bce_exp) ** GAMMA * bce_mean


def _focal_loss_ref(inputs, targets):
    """Pure-JAX reference mirroring the PyTorch module (sigmoid + clamped logs)."""
    p = jax.nn.sigmoid(inputs.reshape(-1).astype(jnp.float32))
    t = targets.reshape(-1).astype(jnp.float32)
    log_p = jnp.maximum(jnp.log(p), -100.0)
    log_1mp = jnp.maximum(jnp.log(1.0 - p), -100.0)
    bce = jnp.mean(-(t * log_p + (1.0 - t) * log_1mp))
    return ALPHA * (1.0 - jnp.exp(-bce)) ** GAMMA * bce


if __name__ == "__main__":
    key = jax.random.PRNGKey(0)
    k_in, k_tg, k_in2, k_tg2 = jax.random.split(key, 4)

    # NCHW like the PyTorch module's typical segmentation use: [2, 4, 16, 16]
    inputs = jax.random.normal(k_in, (2, 4, 16, 16), dtype=jnp.float32)
    targets = jax.random.bernoulli(k_tg, 0.5, (2, 4, 16, 16)).astype(jnp.float32)

    loss = jax.block_until_ready(focal_loss(inputs, targets))
    ref = _focal_loss_ref(inputs, targets)
    assert jnp.allclose(loss, ref, rtol=1e-5, atol=1e-6), (loss, ref)

    # Ragged case (numel not a multiple of 1024) with bool targets: exercises
    # the pure-JAX tail path and the narrow target stream.
    inputs2 = jax.random.normal(k_in2, (2, 4, 17, 16), dtype=jnp.float32)
    targets2 = jax.random.bernoulli(k_tg2, 0.5, (2, 4, 17, 16))
    loss2 = jax.block_until_ready(focal_loss(inputs2, targets2))
    ref2 = _focal_loss_ref(inputs2, targets2)
    assert jnp.allclose(loss2, ref2, rtol=1e-5, atol=1e-6), (loss2, ref2)

    print("KERNEL_OK")
</pallas_src>

<mosaic_0001>
module attributes {stable_mosaic.version = 11 : i64} {
  func.func @_bce_partial_sum_kernel(%arg0: i32, %arg1: i32, %arg2: memref<16x128xf32, #tpu.memory_space<vmem>>, %arg3: memref<16x128xf32, #tpu.memory_space<vmem>>, %arg4: memref<8x128xf32, #tpu.memory_space<vmem>>, %arg5: memref<8x128xf32, #tpu.memory_space<vmem>>) attributes {dimension_semantics = [#tpu.dimension_semantics<parallel>, #tpu.dimension_semantics<arbitrary>], iteration_bounds = array<i64: 1, 1>, scalar_prefetch = 0 : i64, scratch_operands = 1 : i64, tpu.core_type = #tpu.core_type<tc>, window_params = [{transform_indices = @transform_0, window_bounds = array<i64: 16, 128>}, {transform_indices = @transform_1, window_bounds = array<i64: 16, 128>}, {transform_indices = @transform_2, window_bounds = array<i64: 8, 128>}]} {
    %c0_i32 = arith.constant 0 : i32
    %0 = arith.cmpi eq, %arg1, %c0_i32 : i32
    %1 = arith.extui %0 : i1 to i32
    %c0_i32_0 = arith.constant 0 : i32
    %2 = arith.cmpi ne, %1, %c0_i32_0 : i32
    scf.if %2 {
      %cst_22 = arith.constant 0.000000e+00 : f32
      %51 = vector.broadcast %cst_22 : f32 to vector<8x128xf32>
      %c0_23 = arith.constant 0 : index
      %c0_24 = arith.constant 0 : index
      %52 = vector.load %arg5[%c0_23, %c0_24] : memref<8x128xf32, #tpu.memory_space<vmem>>, vector<8x128xf32>
      tpu.vector_store %arg5[%c0_23, %c0_24], %51 {strides = array<i32>} : memref<8x128xf32, #tpu.memory_space<vmem>>, vector<8x128xf32>,
    } else {
    }
    %c1_i32 = arith.constant 1 : i32
    %3 = arith.muli %arg0, %c1_i32 : i32
    %4 = arith.addi %3, %arg1 : i32
    %c16_i32 = arith.constant 16 : i32
    %5 = arith.muli %4, %c16_i32 : i32
    %c0_i32_1 = arith.constant 0 : i32
    %c1_i32_2 = arith.constant 1 : i32
    %6 = arith.muli %c0_i32_1, %c1_i32_2 : i32
    %c0_i32_3 = arith.constant 0 : i32
    %7 = arith.addi %c0_i32_3, %6 : i32
    %c16_i32_4 = arith.constant 16 : i32
    %8 = arith.muli %7, %c16_i32_4 : i32
    %9 = tpu.assume_multiple %8, 16 : i32
    %10 = arith.index_cast %9 : i32 to index
    %c0 = arith.constant 0 : index
    %11 = vector.load %arg2[%10, %c0] : memref<16x128xf32, #tpu.memory_space<vmem>>, vector<16x128xf32>
    %12 = arith.index_cast %9 : i32 to index
    %c0_5 = arith.constant 0 : index
    %13 = vector.load %arg3[%12, %c0_5] : memref<16x128xf32, #tpu.memory_space<vmem>>, vector<16x128xf32>
    %14 = math.absf %11 : vector<16x128xf32>
    %cst = arith.constant 0.000000e+00 : f32
    %15 = vector.broadcast %cst : f32 to vector<16x128xf32>
    %16 = arith.subf %15, %14 : vector<16x128xf32>
    %17 = math.exp %16 : vector<16x128xf32>
    %cst_6 = arith.constant 1.000000e+00 : f32
    %18 = vector.broadcast %cst_6 : f32 to vector<16x128xf32>
    %19 = arith.addf %18, %17 : vector<16x128xf32>
    %cst_7 = arith.constant 1.000000e+00 : f32
    %20 = vector.broadcast %cst_7 : f32 to vector<16x128xf32>
    %21 = arith.divf %20, %19 : vector<16x128xf32>
    %cst_8 = arith.constant 0.000000e+00 : f32
    %22 = vector.broadcast %cst_8 : f32 to vector<16x128xf32>
    %23 = arith.cmpf oge, %11, %22 : vector<16x128xf32>
    %24 = arith.mulf %17, %21 : vector<16x128xf32>
    %25 = arith.select %23, %21, %24 : vector<16x128xi1>, vector<16x128xf32>
    %26 = math.log %25 : vector<16x128xf32>
    %cst_9 = arith.constant -1.000000e+02 : f32
    %27 = vector.broadcast %cst_9 : f32 to vector<16x128xf32>
    %28 = arith.maximumf %26, %27 : vector<16x128xf32>
    %cst_10 = arith.constant 1.000000e+00 : f32
    %29 = vector.broadcast %cst_10 : f32 to vector<16x128xf32>
    %30 = arith.subf %29, %25 : vector<16x128xf32>
    %31 = math.log %30 : vector<16x128xf32>
    %cst_11 = arith.constant -1.000000e+02 : f32
    %32 = vector.broadcast %cst_11 : f32 to vector<16x128xf32>
    %33 = arith.maximumf %31, %32 : vector<16x128xf32>
    %34 = arith.subf %28, %33 : vector<16x128xf32>
    %35 = arith.mulf %13, %34 : vector<16x128xf32>
    %36 = arith.addf %33, %35 : vector<16x128xf32>
    %cst_12 = arith.constant 0.000000e+00 : f32
    %37 = vector.broadcast %cst_12 : f32 to vector<16x128xf32>
    %38 = arith.subf %37, %36 : vector<16x128xf32>
    %39 = arith.addi %5, %9 : i32
    %c16_i32_13 = arith.constant 16 : i32
    %40 = arith.addi %39, %c16_i32_13 : i32
    %c16_i32_14 = arith.constant 16 : i32
    %41 = arith.cmpi sle, %40, %c16_i32_14 : i32
    %42 = arith.extui %41 : i1 to i32
    %c0_i32_15 = arith.constant 0 : i32
    %43 = arith.cmpi ne, %42, %c0_i32_15 : i32
    scf.if %43 {
      %c0_22 = arith.constant 0 : index
      %c0_23 = arith.constant 0 : index
      %51 = vector.load %arg5[%c0_22, %c0_23] : memref<8x128xf32, #tpu.memory_space<vmem>>, vector<8x128xf32>
      %52 = vector.shape_cast %38 : vector<16x128xf32> to vector<2x8x128xf32>
      %cst_24 = arith.constant dense<0.000000e+00> : vector<8x128xf32>
      %53 = vector.multi_reduction <add>, %52, %cst_24 [0] : vector<2x8x128xf32> to vector<8x128xf32>
      %54 = arith.addf %51, %53 : vector<8x128xf32>
      %c0_25 = arith.constant 0 : index
      %c0_26 = arith.constant 0 : index
      %55 = vector.load %arg5[%c0_25, %c0_26] : memref<8x128xf32, #tpu.memory_space<vmem>>, vector<8x128xf32>
      tpu.vector_store %arg5[%c0_25, %c0_26], %54 {strides = array<i32>} : memref<8x128xf32, #tpu.memory_space<vmem>>, vector<8x128xf32>,
    } else {
    }
    %c16_i32_16 = arith.constant 16 : i32
    %44 = arith.addi %39, %c16_i32_16 : i32
    %c16_i32_17 = arith.constant 16 : i32
    %45 = arith.cmpi sgt, %44, %c16_i32_17 : i32
    %46 = arith.extui %45 : i1 to i32
    %c0_i32_18 = arith.constant 0 : i32
    %47 = arith.cmpi ne, %46, %c0_i32_18 : i32
    scf.if %47 {
      %51 = tpu.iota {dimensions = array<i32: 0>} : vector<16x128xi32>
      %52 = vector.broadcast %39 : i32 to vector<16x128xi32>
      %53 = arith.addi %52, %51 : vector<16x128xi32>
      %c16_i32_22 = arith.constant 16 : i32
      %54 = vector.broadcast %c16_i32_22 : i32 to vector<16x128xi32>
      %55 = arith.cmpi slt, %53, %54 : vector<16x128xi32>
      %cst_23 = arith.constant 0.000000e+00 : f32
      %56 = vector.broadcast %cst_23 : f32 to vector<16x128xf32>
      %57 = arith.select %55, %38, %56 : vector<16x128xi1>, vector<16x128xf32>
      %c0_24 = arith.constant 0 : index
      %c0_25 = arith.constant 0 : index
      %58 = vector.load %arg5[%c0_24, %c0_25] : memref<8x128xf32, #tpu.memory_space<vmem>>, vector<8x128xf32>
      %59 = vector.shape_cast %57 : vector<16x128xf32> to vector<2x8x128xf32>
      %cst_26 = arith.constant dense<0.000000e+00> : vector<8x128xf32>
      %60 = vector.multi_reduction <add>, %59, %cst_26 [0] : vector<2x8x128xf32> to vector<8x128xf32>
      %61 = arith.addf %58, %60 : vector<8x128xf32>
      %c0_27 = arith.constant 0 : index
      %c0_28 = arith.constant 0 : index
      %62 = vector.load %arg5[%c0_27, %c0_28] : memref<8x128xf32, #tpu.memory_space<vmem>>, vector<8x128xf32>
      tpu.vector_store %arg5[%c0_27, %c0_28], %61 {strides = array<i32>} : memref<8x128xf32, #tpu.memory_space<vmem>>, vector<8x128xf32>,
    } else {
    }
    %c1_i32_19 = arith.constant 1 : i32
    %c0_i32_20 = arith.constant 0 : i32
    %48 = arith.cmpi eq, %arg1, %c0_i32_20 : i32
    %49 = arith.extui %48 : i1 to i32
    %c0_i32_21 = arith.constant 0 : i32
    %50 = arith.cmpi ne, %49, %c0_i32_21 : i32
    scf.if %50 {
      %c0_22 = arith.constant 0 : index
      %c0_23 = arith.constant 0 : index
      %51 = vector.load %arg5[%c0_22, %c0_23] : memref<8x128xf32, #tpu.memory_space<vmem>>, vector<8x128xf32>
      %c0_24 = arith.constant 0 : index
      %c0_25 = arith.constant 0 : index
      %52 = vector.load %arg4[%c0_24, %c0_25] : memref<8x128xf32, #tpu.memory_space<vmem>>, vector<8x128xf32>
      tpu.vector_store %arg4[%c0_24, %c0_25], %51 {strides = array<i32>} : memref<8x128xf32, #tpu.memory_space<vmem>>, vector<8x128xf32>,
    } else {
    }
    return
  }
  func.func @transform_0(%arg0: i32, %arg1: i32) -> (i32, i32) {
    %c1_i32 = arith.constant 1 : i32
    %0 = arith.muli %arg0, %c1_i32 : i32
    %1 = arith.addi %0, %arg1 : i32
    %c0_i32 = arith.constant 0 : i32
    %2 = arith.minsi %1, %c0_i32 : i32
    %c0_i32_0 = arith.constant 0 : i32
    %c0_i32_1 = arith.constant 0 : i32
    return %2, %c0_i32_0 : i32, i32
  }
  func.func @transform_1(%arg0: i32, %arg1: i32) -> (i32, i32) {
    %c1_i32 = arith.constant 1 : i32
    %0 = arith.muli %arg0, %c1_i32 : i32
    %1 = arith.addi %0, %arg1 : i32
    %c0_i32 = arith.constant 0 : i32
    %2 = arith.minsi %1, %c0_i32 : i32
    %c0_i32_0 = arith.constant 0 : i32
    %c0_i32_1 = arith.constant 0 : i32
    return %2, %c0_i32_0 : i32, i32
  }
  func.func @transform_2(%arg0: i32, %arg1: i32) -> (i32, i32) {
    %c0_i32 = arith.constant 0 : i32
    %c0_i32_0 = arith.constant 0 : i32
    return %arg0, %c0_i32 : i32, i32
  }
}

</mosaic_0001>

<bundles_post_ra>
// kernel: focal_loss.1
= control target key start
LH: loop header
LB: loop body
LE: loop exit
PB: predicated region body
PF: predicated region fallthrough
CT: control target
= control target key end

     0   :  { %s223_s0 = inlined_call_operand.vmem [shape: f32[16,128], index: 0, kind: input, shape index: {}]   ;;  %s224_s1 = inlined_call_operand.vmem [shape: f32[16,128], index: 1, kind: input, shape index: {}]   ;;  %s225_s2 = inlined_call_operand.vmem [shape: f32[8,128], index: 2, kind: output, shape index: {}]  }
   0x1   :  { %v82_v0 = vld [vmem:[%s223_s0] sm:$0xff]  ;;  %v83_v1 = vld [vmem:[%s223_s0 + $0x8] sm:$0xff] }
   0x2   :  { %v86_v2 = vand.u32 2147483647, %v82_v0  ;;  %v87_v3 = vand.u32 2147483647, %v83_v1  ;;  %vm100_vm0 = vcmp.ge.f32.partialorder %v82_v0, 0.0  ;;  %vm101_vm1 = vcmp.ge.f32.partialorder %v83_v1, 0.0 }
   0x3   :  { %v84_v31 = vld [vmem:[%s224_s1] sm:$0xff]  ;;  %v85_v33 = vld [vmem:[%s224_s1 + $0x8] sm:$0xff] }
   0x4   :  { %v88_v4 = vsub.f32 0.0, %v86_v2  ;;  %v89_v5 = vsub.f32 0.0, %v87_v3 }
   0x6   :  { %v90_v6 = vmul.f32 1.442695, %v88_v4  ;;  %v92_v7 = vmul.f32 1.442695, %v89_v5 }
   0x8   :  { %177 = vpow2.f32 %v90_v6 }
   0x9   :  { %179 = vpow2.f32 %v92_v7 }
  0x12   :  { %v178_v8 = vpop.eup %177 }
  0x13   :  { %v180_v9 = vpop.eup %179  ;;  %v94_v10 = vadd.f32 1.0, %v178_v8 }
  0x14   :  { %v95_v11 = vadd.f32 1.0, %v180_v9 }
  0x15   :  { %181 = vrcp.f32 %v94_v10 }
  0x16   :  { %183 = vrcp.f32 %v95_v11 }
  0x1f   :  { %v182_v12 = vpop.eup %181 }
  0x20   :  { %v184_v13 = vpop.eup %183  ;;  %v102_v14 = vmul.f32 %v182_v12, %v178_v8 }
  0x21   :  { %v103_v15 = vmul.f32 %v184_v13, %v180_v9 }
  0x22   :  { %v104_v16 = vsel %vm100_vm0, %v182_v12, %v102_v14 }
  0x23   :  { %v105_v17 = vsel %vm101_vm1, %v184_v13, %v103_v15  ;;  %185 = vlog2.f32 %v104_v16  ;;  %v112_v18 = vsub.f32 1.0, %v104_v16 }
  0x24   :  { %187 = vlog2.f32 %v105_v17  ;;  %v113_v19 = vsub.f32 1.0, %v105_v17 }
  0x25   :  { %189 = vlog2.f32 %v112_v18 }
  0x26   :  { %191 = vlog2.f32 %v113_v19 }
  0x2d   :  { %v186_v20 = vpop.eup %185 }
  0x2e   :  { %v188_v21 = vpop.eup %187  ;;  %v107_v22 = vmul.f32 0.6931472, %v186_v20 }
  0x2f   :  { %v190_v23 = vpop.eup %189  ;;  %v109_v24 = vmul.f32 0.6931472, %v188_v21 }
  0x30   :  { %v192_v25 = vpop.eup %191  ;;  %v110_v26 = vmax.f32 %v107_v22, -100.0  ;;  %v115_v27 = vmul.f32 0.6931472, %v190_v23 }
  0x31   :  { %v111_v28 = vmax.f32 %v109_v24, -100.0  ;;  %v117_v29 = vmul.f32 0.6931472, %v192_v25 }
  0x32   :  { %v118_v30 = vmax.f32 %v115_v27, -100.0 }
  0x33   :  { %v119_v32 = vmax.f32 %v117_v29, -100.0 }
  0x34   :  { %v120_v34 = vsub.f32 %v110_v26, %v118_v30 }
  0x35   :  { %v121_v35 = vsub.f32 %v111_v28, %v119_v32 }
  0x36   :  { %v122_v36 = vmul.f32 %v120_v34, %v84_v31 }
  0x37   :  { %v123_v37 = vmul.f32 %v121_v35, %v85_v33 }
  0x38   :  { %v124_v38 = vadd.f32 %v122_v36, %v118_v30 }
  0x39   :  { %v125_v39 = vadd.f32 %v123_v37, %v119_v32 }
  0x3a   :  { %v126_v40 = vsub.f32 0.0, %v124_v38 }
  0x3b   :  { %v127_v41 = vsub.f32 0.0, %v125_v39 }
  0x3d   :  { %v135_v42 = vadd.f32 %v127_v41, %v126_v40 }
  0x3f   :  { %160 = vst [vmem:[%s225_s2] sm:$0xff] %v135_v42 }

</bundles_post_ra>
